<compile_context>
chip_gen: v5e
topology: v5e:2x2
jax: 0.10.0
libtpu: 0.0.40
codegen_flags: <defaults>
</compile_context>

<pallas_src>
import functools

import jax
import jax.numpy as jnp
from jax.experimental import pallas as pl
from jax.experimental.pallas import tpu as pltpu


_MIB = 1 << 20
_VMEM_BUDGET = 44 * _MIB       # conservative per-core working-set target (v7x: 64 MiB/TC)
_VMEM_LIMIT_CAP = 96 * _MIB    # upper bound handed to the compiler


def _round_up(x: int, m: int) -> int:
    return ((x + m - 1) // m) * m


def _pad2d(x, rows: int, cols: int):
    r, c = x.shape
    if r == rows and c == cols:
        return x
    return jnp.pad(x, ((0, rows - r), (0, cols - c)))


def _vmem_limit(estimate: int) -> int:
    return int(min(max(int(estimate * 1.3) + 4 * _MIB, 32 * _MIB), _VMEM_LIMIT_CAP))


# --------------------------------------------------------------------------
# Pass 1: L2-normalize key rows once and store them transposed as (d, n_k).
# --------------------------------------------------------------------------
def _normalize_transpose_kernel(ks_ref, kt_ref, ksT_ref, ktT_ref):
    for x_ref, o_ref in ((ks_ref, ksT_ref), (kt_ref, ktT_ref)):
        x = x_ref[...].astype(jnp.float32)
        ssq = jnp.sum(x * x, axis=-1, keepdims=True)
        # matches F.normalize: x / max(||x||, 1e-12) == x * rsqrt(max(ssq, 1e-24))
        xn = x * jax.lax.rsqrt(jnp.maximum(ssq, 1e-24))
        o_ref[...] = jnp.transpose(xn).astype(o_ref.dtype)   # one-time XLU transpose


# --------------------------------------------------------------------------
# Pass 2: per-query-tile KL(teacher || student) row values.
# --------------------------------------------------------------------------
def _kd_tile_kernel(qs_ref, qt_ref, ksT_ref, ktT_ref, out_ref,
                    *, inv_ts2: float, inv_tt2: float, n_valid_keys: int):
    def norm_scale(q_ref, scale, mm_dtype):
        q = q_ref[...].astype(jnp.float32)
        ssq = jnp.sum(q * q, axis=-1, keepdims=True)
        # fold 1/temp^2 into the normalization scale (EUP rsqrt, no post-matmul div)
        return (q * (jax.lax.rsqrt(jnp.maximum(ssq, 1e-24)) * scale)).astype(mm_dtype)

    # per-branch MXU dtypes (student and teacher inputs may differ)
    qs_n = norm_scale(qs_ref, inv_ts2, ksT_ref.dtype)
    qt_n = norm_scale(qt_ref, inv_tt2, ktT_ref.dtype)

    # plain (tq, d) x (d, n_k) matmuls on the MXU, f32 accumulation, no transpose
    zs = jnp.dot(qs_n, ksT_ref[...], preferred_element_type=jnp.float32)
    zt = jnp.dot(qt_n, ktT_ref[...], preferred_element_type=jnp.float32)

    n_k_pad = zs.shape[-1]
    if n_valid_keys != n_k_pad:
        # padded key columns: push logits to a huge negative value (finite, so
        # zt - zs stays 0 there and exp underflows to exactly 0 mass)
        col = jax.lax.broadcasted_iota(jnp.int32, zs.shape, 1)
        valid = col < n_valid_keys
        zs = jnp.where(valid, zs, jnp.float32(-1e9))
        zt = jnp.where(valid, zt, jnp.float32(-1e9))

    # KL(p_t || q_s) per row, simplified (shift-invariant):
    #   KL = (sum_k e_t*(z_t - z_s))/st + (ms - mt) + log(ss) - log(st)
    mt = jnp.max(zt, axis=-1, keepdims=True)
    et = jnp.exp(zt - mt)
    st = jnp.sum(et, axis=-1, keepdims=True)
    num = jnp.sum(et * (zt - zs), axis=-1, keepdims=True)

    ms = jnp.max(zs, axis=-1, keepdims=True)
    ss = jnp.sum(jnp.exp(zs - ms), axis=-1, keepdims=True)

    out_ref[...] = num / st + (ms - mt) + (jnp.log(ss) - jnp.log(st))


# --------------------------------------------------------------------------
# Wrapper
# --------------------------------------------------------------------------
def kd_loss(queries_student, keys_student, queries_teacher, keys_teacher,
            index=None, *, temp_student: float = 1.0, temp_teacher: float = 1.0,
            tile_q: int = 256):
    """JAX/Pallas equivalent of KDLoss.forward (returned dict only)."""
    del index  # state bookkeeping only; does not affect the returned loss

    n_q, d = queries_student.shape
    n_k = keys_student.shape[0]

    d_pad = _round_up(d, 128)
    n_k_pad = _round_up(n_k, 128)    # lane-dense logits; padded cols masked in-kernel

    q_isz = (jnp.dtype(queries_student.dtype).itemsize
             + jnp.dtype(queries_teacher.dtype).itemsize)
    k_isz = (jnp.dtype(keys_student.dtype).itemsize
             + jnp.dtype(keys_teacher.dtype).itemsize)

    # ---- pass 1: normalize + transpose keys once, gridded over key-row tiles
    blk = max(b for b in (512, 256, 128) if n_k_pad % b == 0)

    def p1_bytes(b):
        io = 2 * b * d_pad * k_isz * 2            # in + out blocks, double-buffered
        tmp = 4 * b * d_pad * 4                   # f32 normalize/transpose temps
        return io + tmp

    while blk > 128 and p1_bytes(blk) > _VMEM_BUDGET:
        blk //= 2

    ks = _pad2d(keys_student, n_k_pad, d_pad)
    kt = _pad2d(keys_teacher, n_k_pad, d_pad)

    ksT, ktT = pl.pallas_call(
        _normalize_transpose_kernel,
        out_shape=(jax.ShapeDtypeStruct((d_pad, n_k_pad), ks.dtype),
                   jax.ShapeDtypeStruct((d_pad, n_k_pad), kt.dtype)),
        grid=(n_k_pad // blk,),
        in_specs=[pl.BlockSpec((blk, d_pad), lambda i: (i, 0)),
                  pl.BlockSpec((blk, d_pad), lambda i: (i, 0))],
        out_specs=(pl.BlockSpec((d_pad, blk), lambda i: (0, i)),
                   pl.BlockSpec((d_pad, blk), lambda i: (0, i))),
        compiler_params=pltpu.CompilerParams(
            dimension_semantics=("parallel",),
            vmem_limit_bytes=_vmem_limit(p1_bytes(blk))),
    )(ks, kt)

    # ---- pass 2: query-row tiles -> per-row KL(teacher || student)
    tq = max(8, _round_up(min(int(tile_q), _round_up(n_q, 8)), 8))

    def p2_bytes(t):
        keys = n_k_pad * d_pad * k_isz            # Buffered(1): single resident copy each
        qrs = t * d_pad * q_isz * 2               # query tiles, double-buffered
        inter = 6 * t * n_k_pad * 4               # f32 logits / exp / KL intermediates
        return keys + qrs + inter + 2 * t * 4

    while tq > 64 and p2_bytes(tq) > _VMEM_BUDGET:
        tq = max(64, _round_up(tq // 2, 8))
    # TODO(synk): if the resident keys alone exceed the budget (huge n_k), a
    # key-tiled online-softmax variant is needed to fit v7x's 64 MiB/TC VMEM.

    n_q_pad = _round_up(n_q, tq)
    num_tiles = n_q_pad // tq

    qs = _pad2d(queries_student, n_q_pad, d_pad)
    qt = _pad2d(queries_teacher, n_q_pad, d_pad)

    kernel = functools.partial(
        _kd_tile_kernel,
        inv_ts2=1.0 / (float(temp_student) ** 2),
        inv_tt2=1.0 / (float(temp_teacher) ** 2),
        n_valid_keys=n_k)

    flops = 4 * n_q_pad * n_k_pad * d_pad + 12 * n_q_pad * n_k_pad
    transcendentals = 2 * n_q_pad * n_k_pad + 4 * n_q_pad
    bytes_accessed = (n_q_pad * d_pad * q_isz + n_k_pad * d_pad * k_isz
                      + n_q_pad * 4)

    row_kl = pl.pallas_call(
        kernel,
        out_shape=jax.ShapeDtypeStruct((n_q_pad, 1), jnp.float32),
        grid=(num_tiles,),
        in_specs=[
            pl.BlockSpec((tq, d_pad), lambda i: (i, 0)),          # student queries (pipelined)
            pl.BlockSpec((tq, d_pad), lambda i: (i, 0)),          # teacher queries (pipelined)
            pl.BlockSpec((d_pad, n_k_pad), lambda i: (0, 0),      # resident keys, single copy
                         pipeline_mode=pl.Buffered(1)),
            pl.BlockSpec((d_pad, n_k_pad), lambda i: (0, 0),
                         pipeline_mode=pl.Buffered(1)),
        ],
        out_specs=pl.BlockSpec((tq, 1), lambda i: (i, 0)),
        compiler_params=pltpu.CompilerParams(
            dimension_semantics=("parallel",),                    # v7x: tiles split across 2 TCs
            vmem_limit_bytes=_vmem_limit(p2_bytes(tq))),
        cost_estimate=pl.CostEstimate(flops=flops,
                                      transcendentals=transcendentals,
                                      bytes_accessed=bytes_accessed),
    )(qs, qt, ksT, ktT)

    # batchmean over the ORIGINAL number of queries; padded rows are exact zeros
    loss = jnp.sum(row_kl) / float(n_q)
    return {"grad_estimator": loss, "loss": loss}


# --------------------------------------------------------------------------
# Pure-JAX reference mirroring the PyTorch forward
# --------------------------------------------------------------------------
def _reference(qs, ks, qt, kt, temp_s, temp_t):
    def norm(x):
        return x / jnp.maximum(jnp.linalg.norm(x, axis=-1, keepdims=True), 1e-12)
    sim_s = norm(qs) @ norm(ks).T / temp_s
    sim_t = norm(qt) @ norm(kt).T / temp_t
    log_q = jax.nn.log_softmax(sim_s / temp_s, axis=-1)
    p = jax.nn.softmax(sim_t / temp_t, axis=-1)
    # torch.nn.functional.kl_div(log_q, p, reduction='batchmean')
    return jnp.sum(p * (jnp.log(p) - log_q)) / qs.shape[0]


if __name__ == "__main__":
    key = jax.random.PRNGKey(0)
    k1, k2, k3, k4 = jax.random.split(key, 4)

    # small, deliberately unaligned shapes: exercises feature/key padding
    # (d 96->128, n_k 24->128 with masking) and a multi-tile query grid
    # (tile_q=16 -> 3 tiles, last one partially zero-padded).
    N, M, D = 40, 24, 96
    temp_student, temp_teacher = 0.7, 0.5

    queries_student = jax.random.normal(k1, (N, D), dtype=jnp.float32)
    keys_student = jax.random.normal(k2, (M, D), dtype=jnp.float32)
    queries_teacher = jax.random.normal(k3, (N, D), dtype=jnp.float32)
    keys_teacher = jax.random.normal(k4, (M, D), dtype=jnp.float32)
    index = jnp.arange(N, dtype=jnp.int32)   # signature parity; unused by the loss

    out = kd_loss(queries_student, keys_student, queries_teacher, keys_teacher, index,
                  temp_student=temp_student, temp_teacher=temp_teacher, tile_q=16)
    jax.block_until_ready(out)

    ref = _reference(queries_student, keys_student, queries_teacher, keys_teacher,
                     temp_student, temp_teacher)
    assert jnp.allclose(out["loss"], ref, atol=1e-4, rtol=1e-3), (out["loss"], ref)
    assert jnp.allclose(out["grad_estimator"], ref, atol=1e-4, rtol=1e-3)

    # mixed-dtype smoke test (bf16 student, f32 teacher): exercises the
    # per-branch MXU dtype path; finiteness check only (bf16 tolerance is loose).
    out_mixed = kd_loss(queries_student.astype(jnp.bfloat16),
                        keys_student.astype(jnp.bfloat16),
                        queries_teacher, keys_teacher, index,
                        temp_student=temp_student, temp_teacher=temp_teacher)
    jax.block_until_ready(out_mixed)
    assert bool(jnp.isfinite(out_mixed["loss"]))

    print("KERNEL_OK")
</pallas_src>

<mosaic_0001>
module attributes {stable_mosaic.version = 11 : i64} {
  func.func @_normalize_transpose_kernel(%arg0: i32, %arg1: memref<128x128xf32, #tpu.memory_space<vmem>>, %arg2: memref<128x128xf32, #tpu.memory_space<vmem>>, %arg3: memref<128x128xf32, #tpu.memory_space<vmem>>, %arg4: memref<128x128xf32, #tpu.memory_space<vmem>>) attributes {dimension_semantics = [#tpu.dimension_semantics<parallel>], iteration_bounds = array<i64: 1>, scalar_prefetch = 0 : i64, scratch_operands = 0 : i64, tpu.core_type = #tpu.core_type<tc>, window_params = [{transform_indices = @transform_0, window_bounds = array<i64: 128, 128>}, {transform_indices = @transform_1, window_bounds = array<i64: 128, 128>}, {transform_indices = @transform_2, window_bounds = array<i64: 128, 128>}, {transform_indices = @transform_3, window_bounds = array<i64: 128, 128>}]} {
    %c0 = arith.constant 0 : index
    %c0_0 = arith.constant 0 : index
    %0 = vector.load %arg1[%c0, %c0_0] : memref<128x128xf32, #tpu.memory_space<vmem>>, vector<128x128xf32>
    %1 = arith.mulf %0, %0 : vector<128x128xf32>
    %cst = arith.constant dense<0.000000e+00> : vector<128xf32>
    %2 = vector.multi_reduction <add>, %1, %cst [1] : vector<128x128xf32> to vector<128xf32>
    %3 = vector.shape_cast %2 : vector<128xf32> to vector<128x1xf32>
    %cst_1 = arith.constant 1.000000e-24 : f32
    %4 = vector.broadcast %cst_1 : f32 to vector<128x1xf32>
    %5 = arith.maximumf %3, %4 : vector<128x1xf32>
    %6 = math.rsqrt %5 : vector<128x1xf32>
    %7 = vector.broadcast %6 : vector<128x1xf32> to vector<128x128xf32>
    %8 = arith.mulf %0, %7 : vector<128x128xf32>
    %9 = tpu.transpose %8, [1, 0] : vector<128x128xf32> -> vector<128x128xf32>
    %c0_2 = arith.constant 0 : index
    %c0_3 = arith.constant 0 : index
    %10 = vector.load %arg3[%c0_2, %c0_3] : memref<128x128xf32, #tpu.memory_space<vmem>>, vector<128x128xf32>
    tpu.vector_store %arg3[%c0_2, %c0_3], %9 {strides = array<i32>} : memref<128x128xf32, #tpu.memory_space<vmem>>, vector<128x128xf32>,
    %c0_4 = arith.constant 0 : index
    %c0_5 = arith.constant 0 : index
    %11 = vector.load %arg2[%c0_4, %c0_5] : memref<128x128xf32, #tpu.memory_space<vmem>>, vector<128x128xf32>
    %12 = arith.mulf %11, %11 : vector<128x128xf32>
    %cst_6 = arith.constant dense<0.000000e+00> : vector<128xf32>
    %13 = vector.multi_reduction <add>, %12, %cst_6 [1] : vector<128x128xf32> to vector<128xf32>
    %14 = vector.shape_cast %13 : vector<128xf32> to vector<128x1xf32>
    %cst_7 = arith.constant 1.000000e-24 : f32
    %15 = vector.broadcast %cst_7 : f32 to vector<128x1xf32>
    %16 = arith.maximumf %14, %15 : vector<128x1xf32>
    %17 = math.rsqrt %16 : vector<128x1xf32>
    %18 = vector.broadcast %17 : vector<128x1xf32> to vector<128x128xf32>
    %19 = arith.mulf %11, %18 : vector<128x128xf32>
    %20 = tpu.transpose %19, [1, 0] : vector<128x128xf32> -> vector<128x128xf32>
    %c0_8 = arith.constant 0 : index
    %c0_9 = arith.constant 0 : index
    %21 = vector.load %arg4[%c0_8, %c0_9] : memref<128x128xf32, #tpu.memory_space<vmem>>, vector<128x128xf32>
    tpu.vector_store %arg4[%c0_8, %c0_9], %20 {strides = array<i32>} : memref<128x128xf32, #tpu.memory_space<vmem>>, vector<128x128xf32>,
    return
  }
  func.func @transform_0(%arg0: i32) -> (i32, i32) {
    %c0_i32 = arith.constant 0 : i32
    %c0_i32_0 = arith.constant 0 : i32
    return %arg0, %c0_i32 : i32, i32
  }
  func.func @transform_1(%arg0: i32) -> (i32, i32) {
    %c0_i32 = arith.constant 0 : i32
    %c0_i32_0 = arith.constant 0 : i32
    return %arg0, %c0_i32 : i32, i32
  }
  func.func @transform_2(%arg0: i32) -> (i32, i32) {
    %c0_i32 = arith.constant 0 : i32
    %c0_i32_0 = arith.constant 0 : i32
    return %c0_i32, %arg0 : i32, i32
  }
  func.func @transform_3(%arg0: i32) -> (i32, i32) {
    %c0_i32 = arith.constant 0 : i32
    %c0_i32_0 = arith.constant 0 : i32
    return %c0_i32, %arg0 : i32, i32
  }
}

</mosaic_0001>

<bundles_post_ra>
// kernel: tpu_custom_call.1
= control target key start
LH: loop header
LB: loop body
LE: loop exit
PB: predicated region body
PF: predicated region fallthrough
CT: control target
= control target key end

     0   :  { %9 = vsyncpa [#allocation3], 0  ;;  %s1481_s0 = inlined_call_operand.hbm [shape: f32[128,128], index: 0, kind: input, shape index: {}]   ;;  %s1482_s1 = inlined_call_operand.hbm [shape: f32[128,128], index: 1, kind: input, shape index: {}]   ;;  %s1483_s2 = inlined_call_operand.hbm [shape: f32[128,128], index: 2, kind: output, shape index: {0}]   ;;  %s1484_s3 = inlined_call_operand.hbm [shape: f32[128,128], index: 3, kind: output, shape index: {1}]  }
   0x1   :  { %10 = vsyncpa [#allocation6], 0 }
   0x2   :  { %11 = vsyncpa [#allocation4], 0 }
   0x3   :  { %12 = vsyncpa [#allocation9], 0  ;;  %s17_s14 = sshll.u32 %s1481_s0, 4  ;;  %s867_s15 = smov [#allocation2]   ;;  %s18_s14 = int_to_ptr.hbm [resolvable:$true] %s17_s14 }
   0x4   :  { %s19_s16 = sshll.u32 %s867_s15, 4  ;;  %s30_s19 = sshll.u32 %s1482_s1, 4  ;;  %s20_s16 = int_to_ptr.vmem [resolvable:$true] %s19_s16  ;;  %s31_s19 = int_to_ptr.hbm [resolvable:$true] %s30_s19 }
   0x5   :  { %s868_s20 = smov 128   ;;  %s869_s21 = smov 8  }
   0x6   :  { %25 = dma.hbm_to_vmem [thread:$0]  %s18_s14, 2048, %s20_s16, [#allocation3], %s868_s20, %s868_s20, %s869_s21  }
   0x7   :  { %s870_s22 = smov [#allocation5]  }
   0x8   :  { %s32_s23 = sshll.u32 %s870_s22, 4  ;;  %s33_s23 = int_to_ptr.vmem [resolvable:$true] %s32_s23 }
   0x9   :  { %38 = dma.hbm_to_vmem [thread:$0]  %s31_s19, 2048, %s33_s23, [#allocation6], %s868_s20, %s868_s20, %s869_s21  }
   0xa   :  { %859 = dma.done.wait [#allocation3], 2048  }
   0xb   :  { %860 = vsyncadd [#allocation3], 4294965248 }
   0xc   :  { %861 = dma.done.wait [#allocation6], 2048  }
   0xd   :  { %862 = vsyncadd [#allocation6], 4294965248  ;;  %v905_v0 = vld [vmem:[#allocation2 + $0x20] sm:$0xff]  ;;  %v913_v4 = vld [vmem:[#allocation2 + $0x10] sm:$0xff]  ;;  %s871_s0 = smov [#allocation7]   ;;  %s661_s26 = sshll.u32 %s1483_s2, 4  ;;  %s662_s26 = int_to_ptr.hbm [resolvable:$true] %s661_s26 }
   0xe   :  { %v907_v1 = vld [vmem:[#allocation2] sm:$0xff]  ;;  %v67_v2 = vmul.f32 %v905_v0, %v905_v0  ;;  %v65_v5 = vmul.f32 %v913_v4, %v913_v4  ;;  %v917_v6 = vld [vmem:[#allocation2 + $0x28] sm:$0xff]  ;;  %v921_v8 = vld [vmem:[#allocation2 + $0x18] sm:$0xff]  ;;  %s659_s1 = sshll.u32 %s871_s0, 4  ;;  %s872_s27 = smov [#allocation8]   ;;  %s660_s1 = int_to_ptr.vmem [resolvable:$true] %s659_s1 }
   0xf   :  { %v63_v3 = vmul.f32 %v907_v1, %v907_v1  ;;  %v919_v7 = vld [vmem:[#allocation2 + $0x8] sm:$0xff]  ;;  %v68_v9 = vmul.f32 %v917_v6, %v917_v6  ;;  %v66_v11 = vmul.f32 %v921_v8, %v921_v8  ;;  %v929_v12 = vld [vmem:[#allocation2 + $0x40] sm:$0xff]  ;;  %v931_v13 = vld [vmem:[#allocation2 + $0x30] sm:$0xff]  ;;  %s672_s28 = sshll.u32 %s872_s27, 4  ;;  %s674_s2 = sshll.u32 %s1484_s3, 4  ;;  %s673_s28 = int_to_ptr.vmem [resolvable:$true] %s672_s28  ;;  %s675_s2 = int_to_ptr.hbm [resolvable:$true] %s674_s2 }
  0x10   :  { %87 = vadd.xlane.f32.xlu2 %v67_v2  ;;  %83 = vadd.xlane.f32.xlu1 %v65_v5  ;;  %v64_v10 = vmul.f32 %v919_v7, %v919_v7  ;;  %v71_v14 = vmul.f32 %v929_v12, %v929_v12  ;;  %v69_v15 = vmul.f32 %v931_v13, %v931_v13  ;;  %v937_v16 = vld [vmem:[#allocation2 + $0x38] sm:$0xff]  ;;  %v941_v18 = vld [vmem:[#allocation2 + $0x48] sm:$0xff]  ;;  %v949_v22 = vld [vmem:[#allocation2 + $0x70] sm:$0xff] }
  0x11   :  { %79 = vadd.xlane.f32.xlu0 %v63_v3  ;;  %v939_v17 = vld [vmem:[#allocation2 + $0x58] sm:$0xff]  ;;  %v70_v19 = vmul.f32 %v937_v16, %v937_v16  ;;  %v72_v21 = vmul.f32 %v941_v18, %v941_v18  ;;  %v951_v23 = vld [vmem:[#allocation2 + $0x60] sm:$0xff]  ;;  %v77_v24 = vmul.f32 %v949_v22, %v949_v22  ;;  %v957_v26 = vld [vmem:[#allocation2 + $0x50] sm:$0xff] }
  0x12   :  { %v74_v20 = vmul.f32 %v939_v17, %v939_v17  ;;  %v75_v25 = vmul.f32 %v951_v23, %v951_v23  ;;  %v959_v27 = vld [vmem:[#allocation5] sm:$0xff]  ;;  %v961_v28 = vld [vmem:[#allocation2 + $0x78] sm:$0xff]  ;;  %v73_v29 = vmul.f32 %v957_v26, %v957_v26  ;;  %v969_v32 = vld [vmem:[#allocation2 + $0x68] sm:$0xff] }
  0x13   :  { %v367_v30 = vmul.f32 %v959_v27, %v959_v27  ;;  %v78_v31 = vmul.f32 %v961_v28, %v961_v28  ;;  %v76_v33 = vmul.f32 %v969_v32, %v969_v32  ;;  %v973_v34 = vld [vmem:[#allocation5 + $0x10] sm:$0xff]  ;;  %v975_v35 = vld [vmem:[#allocation5 + $0x8] sm:$0xff]  ;;  %v981_v38 = vld [vmem:[#allocation5 + $0x18] sm:$0xff] }
  0x14   :  { %v369_v36 = vmul.f32 %v973_v34, %v973_v34  ;;  %v368_v37 = vmul.f32 %v975_v35, %v975_v35  ;;  %v983_v39 = vld [vmem:[#allocation5 + $0x20] sm:$0xff]  ;;  %v370_v40 = vmul.f32 %v981_v38, %v981_v38  ;;  %v989_v42 = vld [vmem:[#allocation5 + $0x28] sm:$0xff]  ;;  %v991_v43 = vld [vmem:[#allocation5 + $0x30] sm:$0xff] }
  0x15   :  { %v371_v41 = vmul.f32 %v983_v39, %v983_v39  ;;  %v372_v44 = vmul.f32 %v989_v42, %v989_v42  ;;  %v373_v45 = vmul.f32 %v991_v43, %v991_v43  ;;  %v997_v46 = vld [vmem:[#allocation5 + $0x38] sm:$0xff]  ;;  %v999_v47 = vld [vmem:[#allocation5 + $0x40] sm:$0xff]  ;;  %v1005_v50 = vld [vmem:[#allocation5 + $0x48] sm:$0xff] }
  0x16   :  { %v374_v48 = vmul.f32 %v997_v46, %v997_v46  ;;  %v375_v49 = vmul.f32 %v999_v47, %v999_v47  ;;  %v1007_v51 = vld [vmem:[#allocation5 + $0x50] sm:$0xff]  ;;  %v376_v52 = vmul.f32 %v1005_v50, %v1005_v50  ;;  %v1013_v54 = vld [vmem:[#allocation5 + $0x58] sm:$0xff]  ;;  %v1015_v55 = vld [vmem:[#allocation5 + $0x60] sm:$0xff] }
  0x17   :  { %v377_v53 = vmul.f32 %v1007_v51, %v1007_v51  ;;  %v378_v56 = vmul.f32 %v1013_v54, %v1013_v54  ;;  %v379_v57 = vmul.f32 %v1015_v55, %v1015_v55  ;;  %v1021_v58 = vld [vmem:[#allocation5 + $0x70] sm:$0xff]  ;;  %v1025_v60 = vld [vmem:[#allocation5 + $0x68] sm:$0xff]  ;;  %v1029_v62 = vld [vmem:[#allocation5 + $0x78] sm:$0xff] }
  0x18   :  { %89 = vadd.xlane.f32.xlu2 %v68_v9  ;;  %85 = vadd.xlane.f32.xlu1 %v66_v11  ;;  %v381_v59 = vmul.f32 %v1021_v58, %v1021_v58  ;;  %v380_v61 = vmul.f32 %v1025_v60, %v1025_v60  ;;  %v382_v63 = vmul.f32 %v1029_v62, %v1029_v62 }
  0x19   :  { %81 = vadd.xlane.f32.xlu0 %v64_v10 }
  0x20   :  { %95 = vadd.xlane.f32.xlu2 %v71_v14  ;;  %93 = vadd.xlane.f32.xlu1 %v70_v19 }
  0x21   :  { %91 = vadd.xlane.f32.xlu0 %v69_v15 }
  0x28   :  { %101 = vadd.xlane.f32.xlu2 %v74_v20  ;;  %99 = vadd.xlane.f32.xlu1 %v73_v29 }
  0x29   :  { %97 = vadd.xlane.f32.xlu0 %v72_v21 }
  0x30   :  { %107 = vadd.xlane.f32.xlu2 %v77_v24  ;;  %105 = vadd.xlane.f32.xlu1 %v76_v33 }
  0x31   :  { %103 = vadd.xlane.f32.xlu0 %v75_v25 }
  0x38   :  { %383 = vadd.xlane.f32.xlu2 %v367_v30 }
  0x39   :  { %109 = vadd.xlane.f32.xlu0 %v78_v31 }
  0x40   :  { %387 = vadd.xlane.f32.xlu2 %v369_v36 }
  0x41   :  { %385 = vadd.xlane.f32.xlu0 %v368_v37 }
  0x48   :  { %391 = vadd.xlane.f32.xlu2 %v371_v41 }
  0x49   :  { %389 = vadd.xlane.f32.xlu0 %v370_v40 }
  0x50   :  { %395 = vadd.xlane.f32.xlu2 %v373_v45 }
  0x51   :  { %393 = vadd.xlane.f32.xlu0 %v372_v44 }
  0x58   :  { %399 = vadd.xlane.f32.xlu2 %v375_v49 }
  0x59   :  { %397 = vadd.xlane.f32.xlu0 %v374_v48 }
  0x60   :  { %403 = vadd.xlane.f32.xlu2 %v377_v53 }
  0x61   :  { %401 = vadd.xlane.f32.xlu0 %v376_v52 }
  0x68   :  { %407 = vadd.xlane.f32.xlu2 %v379_v57 }
  0x69   :  { %405 = vadd.xlane.f32.xlu0 %v378_v56 }
  0x70   :  { %411 = vadd.xlane.f32.xlu2 %v381_v59 }
  0x71   :  { %409 = vadd.xlane.f32.xlu0 %v380_v61 }
  0x79   :  { %413 = vadd.xlane.f32.xlu0 %v382_v63 }
  0x83   :  { %v88_v2 = vpop.xlane.xlu2 %87  ;;  %v84_v9 = vpop.xlane.xlu1 %83 }
  0x84   :  { %v80_v3 = vpop.xlane.xlu0 %79  ;;  %v113_v10 = vmax.f32 %v84_v9, 1e-24  ;;  %v1035_v48 = vmax.f32 %v88_v2, 1e-24 }
  0x85   :  { %v111_v5 = vmax.f32 %v80_v3, 1e-24 }
  0x86   :  { %vm153_vm5 = vweird.f32 %v113_v10  ;;  %vm173_vm13 = vweird.f32 %v1035_v48 }
  0x87   :  { %699 = vrsqrt.f32 %v111_v5  ;;  %vm133_vm1 = vweird.f32 %v111_v5 }
  0x88   :  { %701 = vrsqrt.f32 %v113_v10 }
  0x8b   :  { %v90_v11 = vpop.xlane.xlu2 %89  ;;  %v86_v19 = vpop.xlane.xlu1 %85 }
  0x8c   :  { %v82_v14 = vpop.xlane.xlu0 %81  ;;  %v114_v21 = vmax.f32 %v86_v19, 1e-24 }
  0x8d   :  { %v112_v15 = vmax.f32 %v82_v14, 1e-24  ;;  %v700_v20 = vpop.eup %699  ;;  %v1043_v14 = vmax.f32 %v90_v11, 1e-24 }
  0x8e   :  { %v128_v24 = vmul.f32 %v700_v20, %v111_v5  ;;  %v702_v25 = vpop.eup %701  ;;  %vm134_vm0 = vweird.f32 %v700_v20  ;;  %vm163_vm9 = vweird.f32 %v114_v21 }
  0x8f   :  { %703 = vrsqrt.f32 %v112_v15  ;;  %v148_v31 = vmul.f32 %v702_v25, %v113_v10  ;;  %vm135_vm2 = vmor %vm133_vm1, %vm134_vm0  ;;  %vm143_vm4 = vweird.f32 %v112_v15  ;;  %vm154_vm6 = vweird.f32 %v702_v25 }
  0x90   :  { %v129_v29 = vmul.f32 %v700_v20, %v128_v24  ;;  %705 = vrsqrt.f32 %v114_v21  ;;  %vm155_vm8 = vmor %vm153_vm5, %vm154_vm6  ;;  %vm183_vm15 = vweird.f32 %v1043_v14 }
  0x91   :  { %v149_v44 = vmul.f32 %v702_v25, %v148_v31  ;;  %707 = vrsqrt.f32 %v1035_v48 }
  0x92   :  { %v130_v30 = vmul.f32 0.5, %v129_v29  ;;  %709 = vrsqrt.f32 %v1043_v14 }
  0x93   :  { %v1033_v33 = vpop.xlane.xlu2 %95  ;;  %v150_v57 = vmul.f32 0.5, %v149_v44 }
  0x94   :  { %v92_v36 = vpop.xlane.xlu0 %91  ;;  %v131_v37 = vsub.f32 1.5, %v130_v30 }
  0x95   :  { %v704_v40 = vpop.eup %703  ;;  %v151_v2 = vsub.f32 1.5, %v150_v57  ;;  %v1055_v11 = vmax.f32 %v92_v36, 1e-24 }
  0x96   :  { %v138_v41 = vmul.f32 %v704_v40, %v112_v15  ;;  %v706_v45 = vpop.eup %705  ;;  %v132_v49 = vmul.f32 %v700_v20, %v131_v37  ;;  %vm144_vm3 = vweird.f32 %v704_v40 }
  0x97   :  { %v158_v61 = vmul.f32 %v706_v45, %v114_v21  ;;  %vm145_vm7 = vmor %vm143_vm4, %vm144_vm3  ;;  %v152_v29 = vmul.f32 %v702_v25, %v151_v2  ;;  %711 = vrsqrt.f32 %v1055_v11  ;;  %vm164_vm10 = vweird.f32 %v706_v45 }
  0x98   :  { %v139_v52 = vmul.f32 %v704_v40, %v138_v41  ;;  %v136_v53 = vsel %vm135_vm2, %v700_v20, %v132_v49  ;;  %v1045_v20 = vpop.eup %707  ;;  %vm165_vm11 = vmor %vm163_vm9, %vm164_vm10  ;;  %vm193_vm6 = vweird.f32 %v1055_v11 }
  0x99   :  { %v287_v59 = vmul.f32 %v136_v53, %v907_v1  ;;  %v159_v5 = vmul.f32 %v706_v45, %v158_v61  ;;  %v168_v10 = vmul.f32 %v1045_v20, %v1035_v48  ;;  %v156_v41 = vsel %vm155_vm8, %v702_v25, %v152_v29  ;;  %v1059_v44 = vpop.eup %709 }
  0x9a   :  { %v140_v56 = vmul.f32 0.5, %v139_v52  ;;  %v94_v52 = vpop.xlane.xlu1 %93  ;;  %v178_v25 = vmul.f32 %v1059_v44, %v1043_v14  ;;  %vm174_vm12 = vweird.f32 %v1045_v20  ;;  %vm184_vm1 = vweird.f32 %v1059_v44 }
  0x9b   :  { %v1039_v63 = vpop.xlane.xlu2 %101  ;;  %303 = vxpose.xlu1.b32.start [1/16] %v287_v59, 128  ;;  %v160_v1 = vmul.f32 0.5, %v159_v5  ;;  %v1066_v59 = vmax.f32 %v94_v52, 1e-24  ;;  %vm175_vm14 = vmor %vm173_vm13, %vm174_vm12 }
  0x9c   :  { %v1041_v3 = vpop.xlane.xlu0 %97  ;;  %v141_v9 = vsub.f32 1.5, %v140_v56  ;;  %vm1117_vm4 = vmor %vm183_vm15, %vm184_vm1 }
  0x9d   :  { %v161_v15 = vsub.f32 1.5, %v160_v1  ;;  %v1068_v21 = vpop.eup %711 }
  0x9e   :  { %v142_v19 = vmul.f32 %v704_v40, %v141_v9  ;;  %v188_v2 = vmul.f32 %v1068_v21, %v1055_v11  ;;  %vm194_vm5 = vweird.f32 %v1068_v21 }
  0x9f   :  { %v162_v49 = vmul.f32 %v706_v45, %v161_v15 }
  0xa0   :  { %v146_v24 = vsel %vm145_vm7, %v704_v40, %v142_v19  ;;  %v169_v40 = vmul.f32 %v1045_v20, %v168_v10  ;;  %v189_v15 = vmul.f32 %v1068_v21, %v188_v2  ;;  %vm1138_vm7 = vmor %vm193_vm6, %vm194_vm5 }
  0xa1   :  { %v288_v30 = vmul.f32 %v146_v24, %v919_v7  ;;  %v289_v7 = vmul.f32 %v156_v41, %v913_v4  ;;  %v166_v61 = vsel %vm165_vm11, %v706_v45, %v162_v49  ;;  %v179_v4 = vmul.f32 %v1059_v44, %v178_v25 }
  0xa2   :  { %v170_v36 = vmul.f32 0.5, %v169_v40  ;;  %v290_v5 = vmul.f32 %v166_v61, %v921_v8  ;;  %v1087_v40 = vmax.f32 %v1033_v33, 1e-24  ;;  %vm203_vm11 = vweird.f32 %v1066_v59 }
  0xa3   :  { %v1049_v31 = vpop.xlane.xlu2 %107  ;;  %304 = vxpose.xlu1.b32.cont [2/16] %v288_v30, 128  ;;  %v180_v29 = vmul.f32 0.5, %v179_v4 }
  0xa4   :  { %v1051_v37 = vpop.xlane.xlu0 %103  ;;  %v171_v9 = vsub.f32 1.5, %v170_v36 }
  0xa5   :  { %v181_v49 = vsub.f32 1.5, %v180_v29 }
  0xa6   :  { %v172_v45 = vmul.f32 %v1045_v20, %v171_v9 }
  0xa8   :  { %v176_v52 = vsel %vm175_vm14, %v1045_v20, %v172_v45  ;;  %v1100_v20 = vmax.f32 %v1041_v3, 1e-24 }
  0xa9   :  { %v291_v61 = vmul.f32 %v176_v52, %v905_v0 }
  0xab   :  { %v384_v53 = vpop.xlane.xlu2 %383  ;;  %305 = vxpose.xlu1.b32.cont [3/16] %v289_v7, 128 }
  0xac   :  { %v1062_v56 = vpop.xlane.xlu0 %109  ;;  %v415_v57 = vmax.f32 %v384_v53, 1e-24  ;;  %v190_v53 = vmul.f32 0.5, %v189_v15 }
  0xae   :  { %713 = vrsqrt.f32 %v415_v57  ;;  %vm437_vm2 = vweird.f32 %v415_v57 }
  0xaf   :  { %715 = vrsqrt.f32 %v1066_v59 }
  0xb3   :  { %v388_v19 = vpop.xlane.xlu2 %387  ;;  %306 = vxpose.xlu1.b32.cont [4/16] %v290_v5, 128  ;;  %v182_v5 = vmul.f32 %v1059_v44, %v181_v49 }
  0xb4   :  { %v386_v1 = vpop.xlane.xlu0 %385  ;;  %v714_v24 = vpop.eup %713  ;;  %v1076_v30 = vmax.f32 %v388_v19, 1e-24 }
  0xb5   :  { %v1078_v10 = vmax.f32 %v386_v1, 1e-24  ;;  %v432_v41 = vmul.f32 %v714_v24, %v415_v57  ;;  %v1084_v8 = vpop.eup %715  ;;  %vm438_vm0 = vweird.f32 %v714_v24  ;;  %v191_v1 = vsub.f32 1.5, %v190_v53 }
  0xb6   :  { %717 = vrsqrt.f32 %v1076_v30  ;;  %v198_v48 = vmul.f32 %v1084_v8, %v1066_v59  ;;  %vm439_vm3 = vmor %vm437_vm2, %vm438_vm0  ;;  %v186_v53 = vsel %vm1117_vm4, %v1059_v44, %v182_v5  ;;  %vm204_vm12 = vweird.f32 %v1084_v8 }
  0xb7   :  { %v433_v7 = vmul.f32 %v714_v24, %v432_v41  ;;  %719 = vrsqrt.f32 %v1078_v10  ;;  %vm447_vm9 = vweird.f32 %v1078_v10  ;;  %vm457_vm13 = vweird.f32 %v1076_v30  ;;  %vm1169_vm15 = vmor %vm203_vm11, %vm204_vm12 }
  0xb8   :  { %721 = vrsqrt.f32 %v1087_v40  ;;  %v199_v15 = vmul.f32 %v1084_v8, %v198_v48  ;;  %vm213_vm4 = vweird.f32 %v1087_v40 }
  0xb9   :  { %v434_v36 = vmul.f32 0.5, %v433_v7 }
  0xba   :  { %v200_v48 = vmul.f32 0.5, %v199_v15 }
  0xbb   :  { %v435_v25 = vsub.f32 1.5, %v434_v36  ;;  %v392_v9 = vpop.xlane.xlu2 %391  ;;  %307 = vxpose.xlu1.b32.cont [5/16] %v291_v61, 128 }
  0xbc   :  { %v390_v33 = vpop.xlane.xlu0 %389  ;;  %v1096_v4 = vpop.eup %717  ;;  %v1110_v3 = vmax.f32 %v392_v9, 1e-24 }
  0xbd   :  { %v1102_v2 = vmax.f32 %v390_v33, 1e-24  ;;  %v720_v19 = vpop.eup %719  ;;  %v452_v0 = vmul.f32 %v1096_v4, %v1076_v30  ;;  %v436_v29 = vmul.f32 %v714_v24, %v435_v25  ;;  %v100_v25 = vpop.xlane.xlu1 %99  ;;  %v292_v33 = vmul.f32 %v186_v53, %v917_v6 }
  0xbe   :  { %v442_v45 = vmul.f32 %v720_v19, %v1078_v10  ;;  %v1127_v36 = vpop.eup %721  ;;  %vm448_vm8 = vweird.f32 %v720_v19  ;;  %vm458_vm14 = vweird.f32 %v1096_v4 }
  0xbf   :  { %723 = vrsqrt.f32 %v1102_v2  ;;  %v453_v41 = vmul.f32 %v1096_v4, %v452_v0  ;;  %v440_v7 = vsel %vm439_vm3, %v714_v24, %v436_v29  ;;  %v192_v24 = vmul.f32 %v1068_v21, %v191_v1  ;;  %vm449_vm10 = vmor %vm447_vm9, %vm448_vm8 }
  0xc0   :  { %725 = vrsqrt.f32 %v1100_v20  ;;  %v443_v49 = vmul.f32 %v720_v19, %v442_v45  ;;  %v591_v52 = vmul.f32 %v440_v7, %v959_v27  ;;  %v208_v44 = vmul.f32 %v1127_v36, %v1087_v40  ;;  %vm459_vm0 = vmor %vm457_vm13, %vm458_vm14 }
  0xc1   :  { %727 = vrsqrt.f32 %v1110_v3  ;;  %v454_v61 = vmul.f32 0.5, %v453_v41  ;;  %v1144_v29 = vmax.f32 %v100_v25, 1e-24  ;;  %v201_v45 = vsub.f32 1.5, %v200_v48 }
  0xc2   :  { %v444_v14 = vmul.f32 0.5, %v443_v49  ;;  %607 = vxpose.xlu2.b32.start [1/16] %v591_v52, 128  ;;  %v196_v11 = vsel %vm1138_vm7, %v1068_v21, %v192_v24  ;;  %v209_v52 = vmul.f32 %v1127_v36, %v208_v44  ;;  %vm467_vm1 = vweird.f32 %v1102_v2 }
  0xc3   :  { %308 = vxpose.xlu1.b32.cont [6/16] %v292_v33, 128  ;;  %v455_v57 = vsub.f32 1.5, %v454_v61  ;;  %v293_v21 = vmul.f32 %v196_v11, %v931_v13  ;;  %729 = vrsqrt.f32 %v1144_v29  ;;  %v202_v48 = vmul.f32 %v1084_v8, %v201_v45 }
  0xc4   :  { %v394_v27 = vpop.xlane.xlu0 %393  ;;  %v445_v5 = vsub.f32 1.5, %v444_v14  ;;  %v210_v61 = vmul.f32 0.5, %v209_v52  ;;  %v1177_v33 = vmax.f32 %v1039_v63, 1e-24  ;;  %vm214_vm3 = vweird.f32 %v1127_v36 }
  0xc5   :  { %v1133_v9 = vpop.eup %723  ;;  %v1148_v15 = vmax.f32 %v394_v27, 1e-24  ;;  %v456_v25 = vmul.f32 %v1096_v4, %v455_v57  ;;  %v206_v44 = vsel %vm1169_vm15, %v1084_v8, %v202_v48  ;;  %vm1221_vm6 = vmor %vm213_vm4, %vm214_vm3  ;;  %vm477_vm8 = vweird.f32 %v1110_v3 }
  0xc6   :  { %v462_v1 = vmul.f32 %v1133_v9, %v1102_v2  ;;  %v1146_v6 = vpop.eup %725  ;;  %v446_v7 = vmul.f32 %v720_v19, %v445_v5  ;;  %v211_v11 = vsub.f32 1.5, %v210_v61  ;;  %v294_v57 = vmul.f32 %v206_v44, %v937_v16 }
  0xc7   :  { %v1155_v49 = vpop.eup %727  ;;  %v218_v53 = vmul.f32 %v1146_v6, %v1100_v20  ;;  %731 = vrsqrt.f32 %v1148_v15  ;;  %v460_v63 = vsel %vm459_vm0, %v1096_v4, %v456_v25  ;;  %vm468_vm2 = vweird.f32 %v1133_v9 }
  0xc8   :  { %v463_v41 = vmul.f32 %v1133_v9, %v462_v1  ;;  %v450_v14 = vsel %vm449_vm10, %v720_v19, %v446_v7  ;;  %v472_v13 = vmul.f32 %v1155_v49, %v1110_v3  ;;  %v396_v19 = vpop.xlane.xlu2 %395  ;;  %733 = vrsqrt.f32 %v1177_v33  ;;  %vm1212_vm5 = vmor %vm467_vm1, %vm468_vm2 }
  0xc9   :  { %v592_v10 = vmul.f32 %v450_v14, %v975_v35  ;;  %v219_v35 = vmul.f32 %v1146_v6, %v218_v53  ;;  %v1182_v27 = vmax.f32 %v396_v19, 1e-24  ;;  %v1187_v5 = vpop.eup %729  ;;  %v593_v8 = vmul.f32 %v460_v63, %v973_v34 }
  0xca   :  { %v464_v24 = vmul.f32 0.5, %v463_v41  ;;  %v473_v1 = vmul.f32 %v1155_v49, %v472_v13  ;;  %v228_v41 = vmul.f32 %v1187_v5, %v1144_v29  ;;  %v212_v16 = vmul.f32 %v1127_v36, %v211_v11 }
  0xcb   :  { %608 = vxpose.xlu2.b32.cont [2/16] %v592_v10, 128  ;;  %309 = vxpose.xlu1.b32.cont [7/16] %v293_v21, 128  ;;  %v220_v30 = vmul.f32 0.5, %v219_v35  ;;  %735 = vrsqrt.f32 %v1182_v27  ;;  %v1207_v21 = vmax.f32 %v1051_v37, 1e-24  ;;  %vm224_vm7 = vweird.f32 %v1146_v6 }
  0xcc   :  { %v465_v0 = vsub.f32 1.5, %v464_v24  ;;  %v474_v4 = vmul.f32 0.5, %v473_v1  ;;  %v398_v52 = vpop.xlane.xlu0 %397  ;;  %v229_v10 = vmul.f32 %v1187_v5, %v228_v41  ;;  %v216_v19 = vsel %vm1221_vm6, %v1127_v36, %v212_v16 }
  0xcd   :  { %v1191_v45 = vpop.eup %731  ;;  %v221_v34 = vsub.f32 1.5, %v220_v30  ;;  %v1217_v48 = vmax.f32 %v398_v52, 1e-24  ;;  %737 = vrsqrt.f32 %v1207_v21  ;;  %vm478_vm9 = vweird.f32 %v1155_v49 }
  0xce   :  { %v482_v7 = vmul.f32 %v1191_v45, %v1148_v15  ;;  %v466_v53 = vmul.f32 %v1133_v9, %v465_v0  ;;  %v1219_v59 = vpop.eup %733  ;;  %v475_v37 = vsub.f32 1.5, %v474_v4  ;;  %v230_v25 = vmul.f32 0.5, %v229_v10  ;;  %vm1248_vm11 = vmor %vm477_vm8, %vm478_vm9 }
  0xcf   :  { %739 = vrsqrt.f32 %v1217_v48  ;;  %v295_v36 = vmul.f32 %v216_v19, %v929_v12  ;;  %v238_v3 = vmul.f32 %v1219_v59, %v1177_v33  ;;  %vm223_vm10 = vweird.f32 %v1100_v20 }
  0xd0   :  { %v483_v40 = vmul.f32 %v1191_v45, %v482_v7  ;;  %v470_v2 = vsel %vm1212_vm5, %v1133_v9, %v466_v53  ;;  %v222_v9 = vmul.f32 %v1146_v6, %v221_v34  ;;  %v400_v0 = vpop.xlane.xlu2 %399  ;;  %v476_v1 = vmul.f32 %v1155_v49, %v475_v37  ;;  %vm1254_vm12 = vmor %vm223_vm10, %vm224_vm7 }
  0xd1   :  { %v1229_v13 = vpop.eup %735  ;;  %v594_v61 = vmul.f32 %v470_v2, %v981_v38  ;;  %v106_v38 = vpop.xlane.xlu1 %105  ;;  %v231_v12 = vsub.f32 1.5, %v230_v25  ;;  %v1258_v30 = vmax.f32 %v400_v0, 1e-24  ;;  %v239_v53 = vmul.f32 %v1219_v59, %v238_v3 }
  0xd2   :  { %v484_v35 = vmul.f32 0.5, %v483_v40  ;;  %v492_v44 = vmul.f32 %v1229_v13, %v1182_v27  ;;  %v226_v20 = vsel %vm1254_vm12, %v1146_v6, %v222_v9  ;;  %v1266_v4 = vmax.f32 %v106_v38, 1e-24 }
  0xd3   :  { %609 = vxpose.xlu2.b32.cont [3/16] %v593_v8, 128  ;;  %310 = vxpose.xlu1.b32.cont [8/16] %v294_v57, 128  ;;  %v1263_v57 = vpop.eup %737  ;;  %v480_v7 = vsel %vm1248_vm11, %v1155_v49, %v476_v1  ;;  %vm233_vm13 = vweird.f32 %v1144_v29  ;;  %vm234_vm14 = vweird.f32 %v1187_v5  ;;  %vm487_vm15 = vweird.f32 %v1148_v15 }
  0xd4   :  { %v485_v8 = vsub.f32 1.5, %v484_v35  ;;  %v493_v41 = vmul.f32 %v1229_v13, %v492_v44  ;;  %vm488_vm0 = vweird.f32 %v1191_v45  ;;  %741 = vrsqrt.f32 %v1258_v30  ;;  %vm1282_vm1 = vmor %vm233_vm13, %vm234_vm14  ;;  %v402_v15 = vpop.xlane.xlu0 %401 }
  0xd5   :  { %v1271_v52 = vpop.eup %739  ;;  %v296_v6 = vmul.f32 %v226_v20, %v941_v18  ;;  %v595_v16 = vmul.f32 %v480_v7, %v983_v39  ;;  %v232_v49 = vmul.f32 %v1187_v5, %v231_v12  ;;  %743 = vrsqrt.f32 %v1266_v4  ;;  %vm1292_vm2 = vmor %vm487_vm15, %vm488_vm0 }
  0xd6   :  { %v494_v34 = vmul.f32 0.5, %v493_v41  ;;  %v502_v29 = vmul.f32 %v1271_v52, %v1217_v48  ;;  %v486_v10 = vmul.f32 %v1191_v45, %v485_v8  ;;  %v240_v24 = vmul.f32 0.5, %v239_v53 }
  0xd7   :  { %v248_v18 = vmul.f32 %v1263_v57, %v1207_v21  ;;  %v1296_v37 = vmax.f32 %v402_v15, 1e-24  ;;  %v236_v40 = vsel %vm1282_vm1, %v1187_v5, %v232_v49  ;;  %v1302_v2 = vmax.f32 %v1049_v31, 1e-24 }
  0xd8   :  { %v495_v19 = vsub.f32 1.5, %v494_v34  ;;  %v503_v25 = vmul.f32 %v1271_v52, %v502_v29  ;;  %v241_v35 = vsub.f32 1.5, %v240_v24  ;;  %vm497_vm3 = vweird.f32 %v1182_v27  ;;  %v404_v1 = vpop.xlane.xlu2 %403 }
  0xd9   :  { %v249_v44 = vmul.f32 %v1263_v57, %v248_v18  ;;  %vm498_vm4 = vweird.f32 %v1229_v13  ;;  %v297_v31 = vmul.f32 %v236_v40, %v957_v26  ;;  %745 = vrsqrt.f32 %v1296_v37 }
  0xda   :  { %v1308_v9 = vpop.eup %741  ;;  %747 = vrsqrt.f32 %v1302_v2  ;;  %v496_v3 = vmul.f32 %v1229_v13, %v495_v19  ;;  %vm244_vm5 = vweird.f32 %v1219_v59  ;;  %vm1323_vm6 = vmor %vm497_vm3, %vm498_vm4  ;;  %v1331_v38 = vmax.f32 %v1062_v56, 1e-24 }
  0xdb   :  { %610 = vxpose.xlu2.b32.cont [4/16] %v594_v61, 128  ;;  %311 = vxpose.xlu1.b32.cont [9/16] %v295_v36, 128  ;;  %v490_v61 = vsel %vm1292_vm2, %v1191_v45, %v486_v10  ;;  %v1311_v36 = vpop.eup %743  ;;  %v504_v45 = vmul.f32 0.5, %v503_v25  ;;  %v512_v0 = vmul.f32 %v1308_v9, %v1258_v30  ;;  %v250_v27 = vmul.f32 0.5, %v249_v44 }
  0xdc   :  { %v596_v5 = vmul.f32 %v490_v61, %v989_v42  ;;  %v258_v26 = vmul.f32 %v1311_v36, %v1266_v4  ;;  %v242_v42 = vmul.f32 %v1219_v59, %v241_v35  ;;  %vm243_vm7 = vweird.f32 %v1177_v33  ;;  %v406_v14 = vpop.xlane.xlu0 %405 }
  0xdd   :  { %v1334_v11 = vmax.f32 %v404_v1, 1e-24  ;;  %vm1336_vm8 = vmor %vm243_vm7, %vm244_vm5  ;;  %v505_v20 = vsub.f32 1.5, %v504_v45  ;;  %v513_v8 = vmul.f32 %v1308_v9, %v512_v0  ;;  %v500_v41 = vsel %vm1323_vm6, %v1229_v13, %v496_v3 }
  0xde   :  { %v251_v56 = vsub.f32 1.5, %v250_v27  ;;  %v259_v53 = vmul.f32 %v1311_v36, %v258_v26  ;;  %v246_v33 = vsel %vm1336_vm8, %v1219_v59, %v242_v42  ;;  %749 = vrsqrt.f32 %v1331_v38 }
  0xdf   :  { %v1344_v7 = vpop.eup %745  ;;  %vm507_vm9 = vweird.f32 %v1217_v48  ;;  %vm508_vm10 = vweird.f32 %v1271_v52  ;;  %751 = vrsqrt.f32 %v1334_v11  ;;  %v597_v13 = vmul.f32 %v500_v41, %v991_v43 }
  0xe0   :  { %v522_v49 = vmul.f32 %v1344_v7, %v1296_v37  ;;  %v298_v34 = vmul.f32 %v246_v33, %v939_v17  ;;  %v506_v59 = vmul.f32 %v1271_v52, %v505_v20  ;;  %vm254_vm11 = vweird.f32 %v1263_v57  ;;  %vm1364_vm12 = vmor %vm507_vm9, %vm508_vm10 }
  0xe1   :  { %v260_v15 = vmul.f32 0.5, %v259_v53  ;;  %v252_v43 = vmul.f32 %v1263_v57, %v251_v56  ;;  %vm253_vm13 = vweird.f32 %v1207_v21  ;;  %v1370_v17 = vmax.f32 %v406_v14, 1e-24 }
  0xe2   :  { %vm1374_vm14 = vmor %vm253_vm13, %vm254_vm11  ;;  %v523_v39 = vmul.f32 %v1344_v7, %v522_v49  ;;  %v510_v40 = vsel %vm1364_vm12, %v1271_v52, %v506_v59  ;;  %vm517_vm15 = vweird.f32 %v1258_v30  ;;  %vm518_vm0 = vweird.f32 %v1308_v9 }
  0xe3   :  { %611 = vxpose.xlu2.b32.cont [5/16] %v595_v16, 128  ;;  %312 = vxpose.xlu1.b32.cont [10/16] %v296_v6, 128  ;;  %v1350_v6 = vpop.eup %747  ;;  %v514_v16 = vmul.f32 0.5, %v513_v8  ;;  %v261_v21 = vsub.f32 1.5, %v260_v15  ;;  %v256_v61 = vsel %vm1374_vm14, %v1263_v57, %v252_v43  ;;  %vm263_vm1 = vweird.f32 %v1266_v4  ;;  %vm1400_vm3 = vmor %vm517_vm15, %vm518_vm0 }
  0xe4   :  { %v268_v29 = vmul.f32 %v1350_v6, %v1302_v2  ;;  %v1372_v10 = vpop.eup %749  ;;  %vm264_vm2 = vweird.f32 %v1311_v36  ;;  %753 = vrsqrt.f32 %v1370_v17  ;;  %v598_v52 = vmul.f32 %v510_v40, %v997_v46  ;;  %v410_v56 = vpop.xlane.xlu0 %409 }
  0xe5   :  { %v515_v18 = vsub.f32 1.5, %v514_v16  ;;  %v1382_v19 = vpop.eup %751  ;;  %v524_v35 = vmul.f32 0.5, %v523_v39  ;;  %v278_v45 = vmul.f32 %v1372_v10, %v1331_v38  ;;  %v262_v46 = vmul.f32 %v1311_v36, %v261_v21  ;;  %vm1405_vm4 = vmor %vm263_vm1, %vm264_vm2 }
  0xe6   :  { %v269_v25 = vmul.f32 %v1350_v6, %v268_v29  ;;  %v532_v44 = vmul.f32 %v1382_v19, %v1334_v11  ;;  %vm527_vm5 = vweird.f32 %v1296_v37  ;;  %vm528_vm6 = vweird.f32 %v1344_v7 }
  0xe7   :  { %v516_v57 = vmul.f32 %v1308_v9, %v515_v18  ;;  %v279_v42 = vmul.f32 %v1372_v10, %v278_v45  ;;  %v266_v12 = vsel %vm1405_vm4, %v1311_v36, %v262_v46  ;;  %vm274_vm7 = vweird.f32 %v1350_v6  ;;  %vm1430_vm8 = vmor %vm527_vm5, %vm528_vm6 }
  0xe8   :  { %v270_v30 = vmul.f32 0.5, %v269_v25  ;;  %v533_v3 = vmul.f32 %v1382_v19, %v532_v44  ;;  %v300_v41 = vmul.f32 %v266_v12, %v969_v32  ;;  %vm273_vm9 = vweird.f32 %v1302_v2 }
  0xe9   :  { %v520_v27 = vsel %vm1400_vm3, %v1308_v9, %v516_v57  ;;  %v280_v36 = vmul.f32 0.5, %v279_v42  ;;  %vm275_vm10 = vmor %vm273_vm9, %vm274_vm7  ;;  %vm537_vm11 = vweird.f32 %v1334_v11  ;;  %vm538_vm12 = vweird.f32 %v1382_v19 }
  0xea   :  { %v1415_v63 = vpop.eup %753  ;;  %v271_v26 = vsub.f32 1.5, %v270_v30  ;;  %v599_v20 = vmul.f32 %v520_v27, %v999_v47  ;;  %v534_v8 = vmul.f32 0.5, %v533_v3  ;;  %v1436_v47 = vmax.f32 %v410_v56, 1e-24  ;;  %vm539_vm14 = vmor %vm537_vm11, %vm538_vm12 }
  0xeb   :  { %612 = vxpose.xlu2.b32.cont [6/16] %v596_v5, 128  ;;  %313 = vxpose.xlu1.b32.cont [11/16] %v297_v31, 128  ;;  %v408_v31 = vpop.xlane.xlu2 %407  ;;  %v299_v5 = vmul.f32 %v256_v61, %v951_v23  ;;  %v525_v23 = vsub.f32 1.5, %v524_v35  ;;  %v542_v9 = vmul.f32 %v1415_v63, %v1370_v17  ;;  %vm284_vm13 = vweird.f32 %v1372_v10 }
  0xec   :  { %v1409_v1 = vmax.f32 %v408_v31, 1e-24  ;;  %v272_v33 = vmul.f32 %v1350_v6, %v271_v26  ;;  %v535_v32 = vsub.f32 1.5, %v534_v8  ;;  %vm283_vm15 = vweird.f32 %v1331_v38  ;;  %v414_v21 = vpop.xlane.xlu0 %413 }
  0xed   :  { %v526_v53 = vmul.f32 %v1344_v7, %v525_v23  ;;  %vm285_vm0 = vmor %vm283_vm15, %vm284_vm13  ;;  %vm547_vm1 = vweird.f32 %v1370_v17  ;;  %vm548_vm2 = vweird.f32 %v1415_v63  ;;  %vm567_vm7 = vweird.f32 %v1436_v47 }
  0xee   :  { %755 = vrsqrt.f32 %v1409_v1  ;;  %v276_v14 = vsel %vm275_vm10, %v1350_v6, %v272_v33  ;;  %vm549_vm3 = vmor %vm547_vm1, %vm548_vm2  ;;  %vm557_vm4 = vweird.f32 %v1409_v1 }
  0xef   :  { %v530_v16 = vsel %vm1430_vm8, %v1344_v7, %v526_v53  ;;  %757 = vrsqrt.f32 %v1436_v47  ;;  %v301_v15 = vmul.f32 %v276_v14, %v949_v22  ;;  %v536_v7 = vmul.f32 %v1382_v19, %v535_v32 }
  0xf0   :  { %v600_v2 = vmul.f32 %v530_v16, %v1005_v50 }
  0xf1   :  { %v540_v24 = vsel %vm539_vm14, %v1382_v19, %v536_v7  ;;  %v430_v19 = vmax.f32 %v414_v21, 1e-24 }
  0xf2   :  { %v601_v39 = vmul.f32 %v540_v24, %v1007_v51 }
  0xf3   :  { %613 = vxpose.xlu2.b32.cont [7/16] %v597_v13, 128  ;;  %314 = vxpose.xlu1.b32.cont [12/16] %v298_v34, 128  ;;  %v543_v13 = vmul.f32 %v1415_v63, %v542_v9  ;;  %v281_v34 = vsub.f32 1.5, %v280_v36  ;;  %v412_v48 = vpop.xlane.xlu2 %411  ;;  %vm587_vm13 = vweird.f32 %v430_v19 }
  0xf4   :  { %v756_v49 = vpop.eup %755  ;;  %v429_v6 = vmax.f32 %v412_v48, 1e-24 }
  0xf5   :  { %v544_v59 = vmul.f32 0.5, %v543_v13  ;;  %v552_v29 = vmul.f32 %v756_v49, %v1409_v1  ;;  %v282_v11 = vmul.f32 %v1372_v10, %v281_v34  ;;  %v758_v18 = vpop.eup %757  ;;  %vm558_vm5 = vweird.f32 %v756_v49 }
  0xf6   :  { %759 = vrsqrt.f32 %v429_v6  ;;  %v562_v25 = vmul.f32 %v758_v18, %v1436_v47  ;;  %vm559_vm6 = vmor %vm557_vm4, %vm558_vm5  ;;  %vm568_vm8 = vweird.f32 %v758_v18  ;;  %vm577_vm10 = vweird.f32 %v429_v6 }
  0xf7   :  { %v545_v50 = vsub.f32 1.5, %v544_v59  ;;  %v553_v43 = vmul.f32 %v756_v49, %v552_v29  ;;  %v286_v22 = vsel %vm285_vm0, %v1372_v10, %v282_v11  ;;  %761 = vrsqrt.f32 %v430_v19  ;;  %vm569_vm9 = vmor %vm567_vm7, %vm568_vm8 }
  0xf8   :  { %v302_v38 = vmul.f32 %v286_v22, %v961_v28 }
  0xf9   :  { %v554_v40 = vmul.f32 0.5, %v553_v43  ;;  %v546_v61 = vmul.f32 %v1415_v63, %v545_v50 }
  0xfb   :  { %614 = vxpose.xlu2.b32.cont [8/16] %v598_v52, 128  ;;  %315 = vxpose.xlu1.b32.cont [13/16] %v299_v5, 128  ;;  %v555_v10 = vsub.f32 1.5, %v554_v40  ;;  %v563_v52 = vmul.f32 %v758_v18, %v562_v25  ;;  %v550_v17 = vsel %vm549_vm3, %v1415_v63, %v546_v61 }
  0xfc   :  { %v760_v35 = vpop.eup %759  ;;  %v602_v51 = vmul.f32 %v550_v17, %v1013_v54 }
  0xfd   :  { %v572_v44 = vmul.f32 %v760_v35, %v429_v6  ;;  %v564_v28 = vmul.f32 0.5, %v563_v52  ;;  %v556_v31 = vmul.f32 %v756_v49, %v555_v10  ;;  %v762_v45 = vpop.eup %761  ;;  %vm578_vm11 = vweird.f32 %v760_v35 }
  0xfe   :  { %v582_v0 = vmul.f32 %v762_v45, %v430_v19  ;;  %vm579_vm12 = vmor %vm577_vm10, %vm578_vm11  ;;  %vm588_vm14 = vweird.f32 %v762_v45 }
  0xff   :  { %v573_v5 = vmul.f32 %v760_v35, %v572_v44  ;;  %v565_v57 = vsub.f32 1.5, %v564_v28  ;;  %v560_v30 = vsel %vm559_vm6, %v756_v49, %v556_v31  ;;  %vm589_vm15 = vmor %vm587_vm13, %vm588_vm14 }
 0x100   :  { %v603_v4 = vmul.f32 %v560_v30, %v1015_v55  ;;  %v583_v23 = vmul.f32 %v762_v45, %v582_v0 }
 0x101   :  { %v574_v46 = vmul.f32 0.5, %v573_v5  ;;  %v566_v1 = vmul.f32 %v758_v18, %v565_v57 }
 0x102   :  { %v584_v63 = vmul.f32 0.5, %v583_v23 }
 0x103   :  { %615 = vxpose.xlu2.b32.cont [9/16] %v599_v20, 128  ;;  %316 = vxpose.xlu1.b32.cont [14/16] %v300_v41, 128  ;;  %v575_v54 = vsub.f32 1.5, %v574_v46  ;;  %v570_v3 = vsel %vm569_vm9, %v758_v18, %v566_v1 }
 0x104   :  { %v604_v27 = vmul.f32 %v570_v3, %v1025_v60  ;;  %v585_v42 = vsub.f32 1.5, %v584_v63 }
 0x105   :  { %v576_v26 = vmul.f32 %v760_v35, %v575_v54 }
 0x106   :  { %v586_v20 = vmul.f32 %v762_v45, %v585_v42 }
 0x107   :  { %v580_v12 = vsel %vm579_vm12, %v760_v35, %v576_v26 }
 0x108   :  { %v605_v55 = vmul.f32 %v580_v12, %v1021_v58  ;;  %v590_v8 = vsel %vm589_vm15, %v762_v45, %v586_v20 }
 0x109   :  { %v606_v9 = vmul.f32 %v590_v8, %v1029_v62 }
 0x10b   :  { %616 = vxpose.xlu2.b32.cont [10/16] %v600_v2, 128  ;;  %317 = vxpose.xlu1.b32.cont [15/16] %v301_v15, 128 }
 0x113   :  { %617 = vxpose.xlu2.b32.cont [11/16] %v601_v39, 128  ;;  %318 = vxpose.xlu1.b32.end [16/16] %v302_v38, 128 }
 0x11b   :  { %618 = vxpose.xlu2.b32.cont [12/16] %v602_v51, 128 }
 0x123   :  { %619 = vxpose.xlu2.b32.cont [13/16] %v603_v4, 128 }
 0x12b   :  { %620 = vxpose.xlu2.b32.cont [14/16] %v604_v27, 128 }
 0x133   :  { %621 = vxpose.xlu2.b32.cont [15/16] %v605_v55, 128 }
 0x13b   :  { %622 = vxpose.xlu2.b32.end [16/16] %v606_v9, 128 }
 0x13f   :  { %v319_v41 = vpop.trf.xlu1 }
 0x140   :  { %335 = vst [vmem:[#allocation7] sm:$0xff] %v319_v41 }
 0x147   :  { %v320_v60 = vpop.trf.xlu1 }
 0x148   :  { %336 = vst [vmem:[#allocation7 + $0x8] sm:$0xff] %v320_v60 }
 0x14f   :  { %v321_v56 = vpop.trf.xlu1 }
 0x150   :  { %337 = vst [vmem:[#allocation7 + $0x10] sm:$0xff] %v321_v56 }
 0x157   :  { %v322_v53 = vpop.trf.xlu1 }
 0x158   :  { %338 = vst [vmem:[#allocation7 + $0x18] sm:$0xff] %v322_v53 }
 0x15c   :  { %v623_v36 = vpop.trf.xlu2 }
 0x15d   :  { %639 = vst [vmem:[#allocation8] sm:$0xff] %v623_v36 }
 0x15f   :  { %v323_v37 = vpop.trf.xlu1 }
 0x160   :  { %339 = vst [vmem:[#allocation7 + $0x20] sm:$0xff] %v323_v37 }
 0x164   :  { %v624_v58 = vpop.trf.xlu2 }
 0x165   :  { %640 = vst [vmem:[#allocation8 + $0x8] sm:$0xff] %v624_v58 }
 0x167   :  { %v324_v33 = vpop.trf.xlu1 }
 0x168   :  { %340 = vst [vmem:[#allocation7 + $0x28] sm:$0xff] %v324_v33 }
 0x16c   :  { %v625_v47 = vpop.trf.xlu2 }
 0x16d   :  { %641 = vst [vmem:[#allocation8 + $0x10] sm:$0xff] %v625_v47 }
 0x16f   :  { %v325_v62 = vpop.trf.xlu1 }
 0x170   :  { %341 = vst [vmem:[#allocation7 + $0x30] sm:$0xff] %v325_v62 }
 0x174   :  { %v626_v32 = vpop.trf.xlu2 }
 0x175   :  { %642 = vst [vmem:[#allocation8 + $0x18] sm:$0xff] %v626_v32 }
 0x177   :  { %v326_v13 = vpop.trf.xlu1 }
 0x178   :  { %342 = vst [vmem:[#allocation7 + $0x38] sm:$0xff] %v326_v13 }
 0x17c   :  { %v627_v16 = vpop.trf.xlu2 }
 0x17d   :  { %643 = vst [vmem:[#allocation8 + $0x20] sm:$0xff] %v627_v16 }
 0x17f   :  { %v327_v49 = vpop.trf.xlu1 }
 0x180   :  { %343 = vst [vmem:[#allocation7 + $0x40] sm:$0xff] %v327_v49 }
 0x184   :  { %v628_v34 = vpop.trf.xlu2 }
 0x185   :  { %644 = vst [vmem:[#allocation8 + $0x28] sm:$0xff] %v628_v34 }
 0x187   :  { %v328_v14 = vpop.trf.xlu1 }
 0x188   :  { %344 = vst [vmem:[#allocation7 + $0x48] sm:$0xff] %v328_v14 }
 0x18c   :  { %v629_v2 = vpop.trf.xlu2 }
 0x18d   :  { %645 = vst [vmem:[#allocation8 + $0x30] sm:$0xff] %v629_v2 }
 0x18f   :  { %v329_v59 = vpop.trf.xlu1 }
 0x190   :  { %345 = vst [vmem:[#allocation7 + $0x50] sm:$0xff] %v329_v59 }
 0x194   :  { %v630_v29 = vpop.trf.xlu2 }
 0x195   :  { %646 = vst [vmem:[#allocation8 + $0x38] sm:$0xff] %v630_v29 }
 0x197   :  { %v330_v48 = vpop.trf.xlu1 }
 0x198   :  { %346 = vst [vmem:[#allocation7 + $0x58] sm:$0xff] %v330_v48 }
 0x19c   :  { %v631_v15 = vpop.trf.xlu2 }
 0x19d   :  { %647 = vst [vmem:[#allocation8 + $0x40] sm:$0xff] %v631_v15 }
 0x19f   :  { %v331_v7 = vpop.trf.xlu1 }
 0x1a0   :  { %347 = vst [vmem:[#allocation7 + $0x60] sm:$0xff] %v331_v7 }
 0x1a4   :  { %v632_v11 = vpop.trf.xlu2 }
 0x1a5   :  { %648 = vst [vmem:[#allocation8 + $0x48] sm:$0xff] %v632_v11 }
 0x1a7   :  { %v332_v6 = vpop.trf.xlu1 }
 0x1a8   :  { %348 = vst [vmem:[#allocation7 + $0x68] sm:$0xff] %v332_v6 }
 0x1ac   :  { %v633_v50 = vpop.trf.xlu2 }
 0x1ad   :  { %649 = vst [vmem:[#allocation8 + $0x50] sm:$0xff] %v633_v50 }
 0x1af   :  { %v333_v43 = vpop.trf.xlu1 }
 0x1b0   :  { %349 = vst [vmem:[#allocation7 + $0x70] sm:$0xff] %v333_v43 }
 0x1b4   :  { %v634_v24 = vpop.trf.xlu2 }
 0x1b5   :  { %650 = vst [vmem:[#allocation8 + $0x58] sm:$0xff] %v634_v24 }
 0x1b7   :  { %v334_v18 = vpop.trf.xlu1 }
 0x1b8   :  { %350 = vst [vmem:[#allocation7 + $0x78] sm:$0xff] %v334_v18 }
 0x1b9   :  { %667 = dma.vmem_to_hbm [thread:$0]  %s660_s1, 2048, %s662_s26, [#allocation4], %s868_s20, %s868_s20, %s869_s21  }
 0x1bc   :  { %v635_v22 = vpop.trf.xlu2 }
 0x1bd   :  { %651 = vst [vmem:[#allocation8 + $0x60] sm:$0xff] %v635_v22 }
 0x1c4   :  { %v636_v39 = vpop.trf.xlu2 }
 0x1c5   :  { %652 = vst [vmem:[#allocation8 + $0x68] sm:$0xff] %v636_v39 }
 0x1cc   :  { %v637_v40 = vpop.trf.xlu2 }
 0x1cd   :  { %653 = vst [vmem:[#allocation8 + $0x70] sm:$0xff] %v637_v40 }
 0x1d4   :  { %v638_v25 = vpop.trf.xlu2 }
 0x1d5   :  { %654 = vst [vmem:[#allocation8 + $0x78] sm:$0xff] %v638_v25 }
 0x1d6   :  { %680 = dma.vmem_to_hbm [thread:$0]  %s673_s28, 2048, %s675_s2, [#allocation9], %s868_s20, %s868_s20, %s869_s21  }
 0x1d7   :  { %863 = dma.done.wait [#allocation4], 2048  }
 0x1d8   :  { %864 = vsyncadd [#allocation4], 4294965248 }
 0x1d9   :  { %865 = dma.done.wait [#allocation9], 2048  }
 0x1da   :  { %866 = vsyncadd [#allocation9], 4294965248 }
 0x1db   :  { %689 = vsyncpa [#allocation3], 1 }
 0x1dc   :  { %690 = vsyncpa [#allocation6], 1 }
 0x1dd   :  { %691 = vsyncpa [#allocation4], 1 }
 0x1de   :  { %692 = vsyncpa [#allocation9], 1 }

</bundles_post_ra>
